<compile_context>
chip_gen: v5e
topology: v5e:2x2
jax: 0.10.0
libtpu: 0.0.40
codegen_flags: <defaults>
</compile_context>

<pallas_src>
import jax
import jax.numpy as jnp
from jax.experimental import pallas as pl
from jax.experimental.pallas import tpu as pltpu

_LANES = 128
# ~2 MiB per block: with in+out each double-buffered that is ~8 MiB of VMEM,
# safely under every generation's default scoped-VMEM limit (incl. v5e 16 MiB)
# while being large enough to sit near the HBM roofline.
_TARGET_BLOCK_BYTES = 2 * 1024 * 1024


def _sublane_pack(dtype):
    """Sublane packing factor: f32 -> 8, bf16 -> 16, int8/fp8 -> 32."""
    itemsize = jnp.dtype(dtype).itemsize
    return max(8, 32 // max(1, itemsize))


# TODO(synk): Regularizer.energy() and Regularizer.grad() are abstract in the
# PyTorch source (raise NotImplementedError); the kernel below implements the
# identity "grad" hot path that a concrete subclass would override.
def _grad_kernel(x_ref, o_ref):
    # Elementwise hot path (identity for the abstract base class).
    o_ref[...] = x_ref[...]


def _grad_pallas_2d(x2d, *, alias_in_out=True):
    """Run the elementwise grad kernel over a lane-dense [R, W] slab."""
    R, W = x2d.shape
    itemsize = jnp.dtype(x2d.dtype).itemsize
    pack = _sublane_pack(x2d.dtype)

    # Block rows: target ~_TARGET_BLOCK_BYTES per block, multiple of the
    # dtype's sublane packing factor, clamped to the full extent.
    tr = _TARGET_BLOCK_BYTES // (W * itemsize)
    tr = max(pack, (tr // pack) * pack)
    if tr >= R:
        tr = R  # full-extent block is always layout-legal

    grid = (pl.cdiv(R, tr),)
    return pl.pallas_call(
        _grad_kernel,
        out_shape=jax.ShapeDtypeStruct((R, W), x2d.dtype),
        grid_spec=pltpu.PrefetchScalarGridSpec(
            num_scalar_prefetch=0,
            grid=grid,
            in_specs=[pl.BlockSpec((tr, W), lambda i: (i, 0))],
            out_specs=pl.BlockSpec((tr, W), lambda i: (i, 0)),
        ),
        compiler_params=pltpu.CompilerParams(
            dimension_semantics=("parallel",)),
        cost_estimate=pl.CostEstimate(
            flops=0, transcendentals=0, bytes_accessed=2 * R * W * itemsize),
        # Identity pass: output may reuse the input HBM buffer.  Concrete
        # subclasses doing out-of-place math should set alias_in_out=False.
        input_output_aliases=({0: 0} if alias_in_out else {}),
    )(x2d)


class Regularizer:
    """JAX/Pallas port of ddr.regularizer.Regularizer (abstract base).

    No parameters (matches the PyTorch __init__, which registers nothing).
    forward(x) == grad(x); grad's elementwise hot path runs in a Pallas kernel.
    """

    def __init__(self):
        self._params = {}  # no parameters in the base class

    def __call__(self, x):
        return self.forward(x)

    def forward(self, x):
        return self.grad(x)

    def energy(self, x):
        raise NotImplementedError

    def grad(self, x):
        orig_shape = x.shape
        n = x.size
        pack = _sublane_pack(x.dtype)

        # Fast path: pick the widest lane-dense last dim that exactly divides
        # the element count -> no pad / slice copies, reshapes are free views.
        width = None
        for w in (2048, 1024, 512, 256, _LANES):
            if n % w == 0:
                width = w
                break

        if width is not None:
            x2d = x.reshape(n // width, width)
            y2d = _grad_pallas_2d(x2d)
            return y2d.reshape(orig_shape)

        # Ragged fall-back (n not a multiple of 128): pad the flat vector to a
        # lane-dense slab, run the kernel, slice the tail back off.
        flat = x.reshape(-1)
        chunk = pack * _LANES
        n_pad = ((n + chunk - 1) // chunk) * chunk
        flat = jnp.pad(flat, (0, n_pad - n))
        x2d = flat.reshape(n_pad // _LANES, _LANES)
        y2d = _grad_pallas_2d(x2d)
        return y2d.reshape(-1)[:n].reshape(orig_shape)

    def get_theta(self):
        """Return all parameters of the regularization (none for the base class)."""
        return self._params.items()

    def get_vis(self):
        raise NotImplementedError


if __name__ == "__main__":
    key = jax.random.PRNGKey(0)
    reg = Regularizer()

    # Small NCHW input consistent with an image regularizer (fast path:
    # 2*4*16*16 = 2048 elements, lane-dense, no pad/slice copies).
    x = jax.random.normal(key, (2, 4, 16, 16), dtype=jnp.float32)
    out = jax.block_until_ready(reg(x))
    assert out.shape == x.shape, (out.shape, x.shape)
    assert out.dtype == x.dtype
    assert bool(jnp.all(out == x))  # base-class grad is identity pass-through

    # Ragged-size input exercising the padded fall-back path.
    x2 = jax.random.normal(jax.random.PRNGKey(1), (3, 5, 7, 11),
                           dtype=jnp.float32)
    out2 = jax.block_until_ready(reg(x2))
    assert out2.shape == x2.shape and out2.dtype == x2.dtype
    assert bool(jnp.all(out2 == x2))

    print("KERNEL_OK")
</pallas_src>

<mosaic_0001>
module attributes {stable_mosaic.version = 11 : i64} {
  func.func @_grad_kernel(%arg0: i32, %arg1: memref<1x2048xf32, #tpu.memory_space<vmem>>, %arg2: memref<1x2048xf32, #tpu.memory_space<vmem>>) attributes {dimension_semantics = [#tpu.dimension_semantics<parallel>], iteration_bounds = array<i64: 1>, scalar_prefetch = 0 : i64, scratch_operands = 0 : i64, tpu.core_type = #tpu.core_type<tc>, window_params = [{transform_indices = @transform_0, window_bounds = array<i64: 1, 2048>}, {transform_indices = @transform_1, window_bounds = array<i64: 1, 2048>}]} {
    %c0 = arith.constant 0 : index
    %c0_0 = arith.constant 0 : index
    %0 = vector.load %arg1[%c0, %c0_0] : memref<1x2048xf32, #tpu.memory_space<vmem>>, vector<1x2048xf32>
    %c0_1 = arith.constant 0 : index
    %c0_2 = arith.constant 0 : index
    %1 = vector.load %arg2[%c0_1, %c0_2] : memref<1x2048xf32, #tpu.memory_space<vmem>>, vector<1x2048xf32>
    tpu.vector_store %arg2[%c0_1, %c0_2], %0 {strides = array<i32>} : memref<1x2048xf32, #tpu.memory_space<vmem>>, vector<1x2048xf32>,
    return
  }
  func.func @transform_0(%arg0: i32) -> (i32, i32) {
    %c0_i32 = arith.constant 0 : i32
    %c0_i32_0 = arith.constant 0 : i32
    return %arg0, %c0_i32 : i32, i32
  }
  func.func @transform_1(%arg0: i32) -> (i32, i32) {
    %c0_i32 = arith.constant 0 : i32
    %c0_i32_0 = arith.constant 0 : i32
    return %arg0, %c0_i32 : i32, i32
  }
}

</mosaic_0001>

<bundles_post_ra>
// kernel: tpu_custom_call.1
= control target key start
LH: loop header
LB: loop body
LE: loop exit
PB: predicated region body
PF: predicated region fallthrough
CT: control target
= control target key end

     0   :  { %6 = vsyncpa [#allocation3], 0  ;;  %s116_s0 = inlined_call_operand.hbm [shape: f32[1,2048], index: 0, kind: input, shape index: {}, may-alias: {0,1}]   ;;  %s117_s1 = inlined_call_operand.hbm [shape: f32[1,2048], index: 1, kind: output, shape index: {}, may-alias: {0,1}]  }
   0x1   :  { %7 = vsyncpa [#allocation4], 0  ;;  %s13_s8 = sshll.u32 %s116_s0, 4  ;;  %s98_s9 = smov [#allocation2]   ;;  %s14_s8 = int_to_ptr.hbm [resolvable:$true] %s13_s8 }
   0x2   :  { %s15_s10 = sshll.u32 %s98_s9, 4  ;;  %s16_s10 = int_to_ptr.vmem [resolvable:$true] %s15_s10 }
   0x3   :  { %18 = dma.hbm_to_vmem [thread:$0]  %s14_s8, 256, %s16_s10, [#allocation3]  }
   0x4   :  { %94 = dma.done.wait [#allocation3], 256  }
   0x5   :  { %95 = vsyncadd [#allocation3], 4294967040  ;;  %s99_s11 = smov [#allocation5]   ;;  %s34_s15 = sshll.u32 %s117_s1, 4  ;;  %v23_v0 = vld [vmem:[#allocation2] sm:$0xff]  ;;  %v24_v1 = vld [vmem:[#allocation2 + $0x8] sm:$0xff]  ;;  %s35_s15 = int_to_ptr.hbm [resolvable:$true] %s34_s15 }
   0x6   :  { %s32_s12 = sshll.u32 %s99_s11, 4  ;;  %25 = vst [vmem:[#allocation5] sm:$0xff] %v23_v0  ;;  %s33_s12 = int_to_ptr.vmem [resolvable:$true] %s32_s12 }
   0x7   :  { %26 = vst [vmem:[#allocation5 + $0x8] sm:$0xff] %v24_v1 }
   0x8   :  { %37 = dma.vmem_to_hbm [thread:$0]  %s33_s12, 256, %s35_s15, [#allocation4]  }
   0x9   :  { %96 = dma.done.wait [#allocation4], 256  }
   0xa   :  { %97 = vsyncadd [#allocation4], 4294967040 }
   0xb   :  { %42 = vsyncpa [#allocation3], 1 }
   0xc   :  { %43 = vsyncpa [#allocation4], 1 }

</bundles_post_ra>
